<compile_context>
chip_gen: v5e
topology: v5e:2x2
jax: 0.10.0
libtpu: 0.0.40
codegen_flags: <defaults>
</compile_context>

<pallas_src>
import functools

import numpy as np
import jax
import jax.numpy as jnp
from jax import lax
from jax.experimental import pallas as pl
from jax.experimental.pallas import tpu as pltpu


LANE = 128


def _round_up(v, m):
    return ((v + m - 1) // m) * m


def cnn_kernel(xf_ref, a_ref, bconv_ref, wf_ref, bias_ref, out_ref, *, r_rows):
    """Fused Conv1d -> ReLU -> MaxPool(2) -> fc2 -> fc3 for one batch tile.

    Batch is lane-resident in every operand / result.

    xf_ref   : (F_rows, TB)   x transposed, row = ci*F + f, batch on lanes
    a_ref    : (2R, F_rows)   structured conv matrix [even | odd] window starts
    bconv_ref: (2R, 1)        conv bias per (c_out, l) row
    wf_ref   : (R, 1)         fused fc weight per pooled row: w_fc2[l]*w_fc3[c]
    bias_ref : (1, 1)         b_fc2 * sum(w_fc3) + b_fc3
    out_ref  : (1, TB)        lane-dense final output
    """
    # One MXU matmul computes every (c_out, pooled-pos, even/odd) conv value
    # for the whole batch tile.
    conv = jnp.dot(a_ref[...], xf_ref[...],
                   preferred_element_type=jnp.float32) + bconv_ref[...]
    # MaxPool1d(2) + ReLU: even/odd halves are sublane-aligned (R % 8 == 0).
    pooled = jnp.maximum(jnp.maximum(conv[:r_rows, :], conv[r_rows:, :]), 0.0)
    # TODO(synk): nn.Dropout is identity at inference; training-mode dropout
    # is not implemented.
    # Fused fc2 o fc3: per-row weight + sublane reduction; output stays
    # lane-dense.
    y = jnp.sum(pooled * wf_ref[...], axis=0, keepdims=True)     # (1, TB)
    out_ref[...] = y + bias_ref[...]


def _pick_batch_tile(batch):
    if batch <= LANE:
        return LANE, 1
    # Keep >= 2 blocks (both v7x TCs busy), cap the tile at 1024 lanes.
    tile = min(1024, _round_up(-(-batch // 2), LANE))
    n_blocks = -(-batch // tile)
    return tile, n_blocks


def cnn_forward(x_ncl, params):
    """x_ncl: (B, C_in, F) float32, PyTorch NCL layout. Returns (B, 1) f32."""
    w_conv, b_conv, w_fc2, b_fc2, w_fc3, b_fc3 = params
    batch, c_in, feat = x_ncl.shape
    c_out, _, ksize = w_conv.shape
    l_conv = feat - ksize + 1
    l_pool = l_conv // 2
    if l_pool < 1:
        raise ValueError("feature_dim too small: pooled length must be >= 1")

    r_rows = _round_up(c_out * l_pool, 8)       # pooled rows, sublane aligned
    f_rows = _round_up(c_in * feat, 8)          # x rows, sublane aligned
    batch_tile, n_blocks = _pick_batch_tile(batch)
    batch_pad = n_blocks * batch_tile

    # ---------- wrapper-side layout plumbing (no compute hoisted) ----------
    # x: (B, C_in, F) -> (C_in*F, B_pad); batch on lanes, read from HBM once.
    xf = jnp.transpose(x_ncl.astype(jnp.float32), (1, 2, 0))
    xf = xf.reshape(c_in * feat, batch)
    xf = jnp.pad(xf, ((0, f_rows - c_in * feat), (0, batch_pad - batch)))

    # Structured conv matrices via a static one-hot over tap positions:
    #   A_e[c*L2+l, ci*F+f] = W[c,ci,f-2l]   if 0 <= f-2l   < K else 0
    #   A_o[c*L2+l, ci*F+f] = W[c,ci,f-2l-1] if 0 <= f-2l-1 < K else 0
    f_idx = np.arange(feat)
    l_idx = np.arange(l_pool)
    k_idx = np.arange(ksize)
    sel_e = (f_idx[None, None, :] ==
             2 * l_idx[:, None, None] + k_idx[None, :, None])
    sel_o = (f_idx[None, None, :] ==
             2 * l_idx[:, None, None] + 1 + k_idx[None, :, None])
    w32 = w_conv.astype(jnp.float32)
    a_e = jnp.einsum('cik,lkf->clif', w32,
                     jnp.asarray(sel_e, jnp.float32)).reshape(c_out * l_pool,
                                                              c_in * feat)
    a_o = jnp.einsum('cik,lkf->clif', w32,
                     jnp.asarray(sel_o, jnp.float32)).reshape(c_out * l_pool,
                                                              c_in * feat)
    pad_rc = ((0, r_rows - c_out * l_pool), (0, f_rows - c_in * feat))
    a_mat = jnp.concatenate([jnp.pad(a_e, pad_rc), jnp.pad(a_o, pad_rc)],
                            axis=0)                                   # (2R, F_rows)

    # Conv bias per (c_out, l) row, duplicated for even/odd halves.
    bconv_col = jnp.repeat(b_conv.astype(jnp.float32), l_pool)
    bconv_col = jnp.pad(bconv_col, (0, r_rows - c_out * l_pool))
    bconv_col = jnp.tile(bconv_col, 2).reshape(2 * r_rows, 1)

    # Fused fc2/fc3 weights; zero rows kill the padded pooled positions.
    wf = (w_fc3.reshape(c_out).astype(jnp.float32)[:, None] *
          w_fc2.reshape(l_pool).astype(jnp.float32)[None, :]).reshape(-1)
    wf = jnp.pad(wf, (0, r_rows - c_out * l_pool)).reshape(r_rows, 1)

    bias_total = (b_fc2.reshape(()) * jnp.sum(w_fc3) + b_fc3.reshape(()))
    bias_total = bias_total.astype(jnp.float32).reshape(1, 1)

    out = pl.pallas_call(
        functools.partial(cnn_kernel, r_rows=r_rows),
        out_shape=jax.ShapeDtypeStruct((1, batch_pad), jnp.float32),
        grid=(n_blocks,),
        in_specs=[
            pl.BlockSpec((f_rows, batch_tile), lambda i: (0, i)),      # x tile
            pl.BlockSpec((2 * r_rows, f_rows), lambda i: (0, 0)),      # conv matrix
            pl.BlockSpec((2 * r_rows, 1), lambda i: (0, 0)),           # conv bias
            pl.BlockSpec((r_rows, 1), lambda i: (0, 0)),               # fused fc weight
            pl.BlockSpec((1, 1), lambda i: (0, 0)),                    # fused fc bias
        ],
        out_specs=pl.BlockSpec((1, batch_tile), lambda i: (0, i)),
        compiler_params=pltpu.CompilerParams(
            dimension_semantics=("parallel",)),
    )(xf, a_mat, bconv_col, wf, bias_total)

    return out[0, :batch].reshape(batch, 1)


def cnn_reference(x, params):
    """Pure-JAX reference mirroring the PyTorch forward exactly (NCL)."""
    w_conv, b_conv, w_fc2, b_fc2, w_fc3, b_fc3 = params
    batch, _, feat = x.shape
    c_out, _, ksize = w_conv.shape
    l_conv = feat - ksize + 1
    l_pool = l_conv // 2
    y = lax.conv_general_dilated(x, w_conv, window_strides=(1,),
                                 padding='VALID',
                                 dimension_numbers=('NCH', 'OIH', 'NCH'))
    y = y + b_conv[None, :, None]
    y = jnp.maximum(y, 0.0)
    y = y[:, :, :2 * l_pool].reshape(batch, c_out, l_pool, 2).max(axis=-1)
    flat = y.reshape(batch * c_out, l_pool)
    y2 = flat @ w_fc2.T + b_fc2
    y2 = y2.reshape(batch, c_out)
    return y2 @ w_fc3.T + b_fc3


if __name__ == "__main__":
    # Small shapes consistent with the module: Conv1d over feature_dim.
    batch, c_in, c_out, ksize, feat = 2, 4, 8, 3, 16
    l_pool = (feat - ksize + 1) // 2   # = 7

    key = jax.random.PRNGKey(0)
    kx, k1, k2, k3, k4, k5, k6 = jax.random.split(key, 7)
    x = jax.random.normal(kx, (batch, c_in, feat), dtype=jnp.float32)
    params = (
        0.1 * jax.random.normal(k1, (c_out, c_in, ksize), dtype=jnp.float32),  # conv1.weight
        0.1 * jax.random.normal(k2, (c_out,), dtype=jnp.float32),              # conv1.bias
        0.1 * jax.random.normal(k3, (1, l_pool), dtype=jnp.float32),           # fc2.weight
        0.1 * jax.random.normal(k4, (1,), dtype=jnp.float32),                  # fc2.bias
        0.1 * jax.random.normal(k5, (1, c_out), dtype=jnp.float32),            # fc3.weight
        0.1 * jax.random.normal(k6, (1,), dtype=jnp.float32),                  # fc3.bias
    )

    out = jax.block_until_ready(cnn_forward(x, params))
    ref = jax.block_until_ready(cnn_reference(x, params))
    assert out.shape == (batch, 1), out.shape
    if not jnp.allclose(out, ref, atol=1e-4, rtol=1e-4):
        raise AssertionError(f"Pallas/reference mismatch:\n{out}\nvs\n{ref}")

    # Exercise the multi-block (2 grid step) path once as well.
    batch2 = 160
    x2 = jax.random.normal(jax.random.PRNGKey(1), (batch2, c_in, feat),
                           dtype=jnp.float32)
    out2 = jax.block_until_ready(cnn_forward(x2, params))
    ref2 = jax.block_until_ready(cnn_reference(x2, params))
    if not jnp.allclose(out2, ref2, atol=1e-4, rtol=1e-4):
        raise AssertionError("Pallas/reference mismatch on multi-tile batch")

    print("KERNEL_OK")
</pallas_src>

<mosaic_0001>
module attributes {stable_mosaic.version = 11 : i64} {
  func.func @cnn_kernel(%arg0: i32, %arg1: memref<64x128xf32, #tpu.memory_space<vmem>>, %arg2: memref<112x64xf32, #tpu.memory_space<vmem>>, %arg3: memref<112x1xf32, #tpu.memory_space<vmem>>, %arg4: memref<56x1xf32, #tpu.memory_space<vmem>>, %arg5: memref<1x1xf32, #tpu.memory_space<vmem>>, %arg6: memref<1x128xf32, #tpu.memory_space<vmem>>) attributes {dimension_semantics = [#tpu.dimension_semantics<parallel>], iteration_bounds = array<i64: 1>, scalar_prefetch = 0 : i64, scratch_operands = 0 : i64, tpu.core_type = #tpu.core_type<tc>, window_params = [{transform_indices = @transform_0, window_bounds = array<i64: 64, 128>}, {pipeline_mode = #tpu.pipeline_mode<synchronous>, transform_indices = @transform_1, window_bounds = array<i64: 112, 64>}, {pipeline_mode = #tpu.pipeline_mode<synchronous>, transform_indices = @transform_2, window_bounds = array<i64: 112, 1>}, {pipeline_mode = #tpu.pipeline_mode<synchronous>, transform_indices = @transform_3, window_bounds = array<i64: 56, 1>}, {pipeline_mode = #tpu.pipeline_mode<synchronous>, transform_indices = @transform_4, window_bounds = array<i64: 1, 1>}, {transform_indices = @transform_5, window_bounds = array<i64: 1, 128>}]} {
    %c0 = arith.constant 0 : index
    %c0_0 = arith.constant 0 : index
    %0 = vector.load %arg2[%c0, %c0_0] : memref<112x64xf32, #tpu.memory_space<vmem>>, vector<112x64xf32>
    %c0_1 = arith.constant 0 : index
    %c0_2 = arith.constant 0 : index
    %1 = vector.load %arg1[%c0_1, %c0_2] : memref<64x128xf32, #tpu.memory_space<vmem>>, vector<64x128xf32>
    %cst = arith.constant dense<0.000000e+00> : vector<112x128xf32>
    %2 = tpu.matmul %0, %1, %cst {dimension_numbers = #tpu.dot_dimension_numbers<[1], [0], [0], [1], [0, 0, 1, 1], [], []>} : vector<112x64xf32>, vector<64x128xf32>, vector<112x128xf32> -> vector<112x128xf32>
    %c0_3 = arith.constant 0 : index
    %c0_4 = arith.constant 0 : index
    %3 = vector.load %arg3[%c0_3, %c0_4] : memref<112x1xf32, #tpu.memory_space<vmem>>, vector<112x1xf32>
    %4 = vector.broadcast %3 : vector<112x1xf32> to vector<112x128xf32>
    %5 = arith.addf %2, %4 : vector<112x128xf32>
    %6 = vector.extract_strided_slice %5 {offsets = [0, 0], sizes = [56, 128], strides = [1, 1]} : vector<112x128xf32> to vector<56x128xf32>
    %7 = vector.extract_strided_slice %5 {offsets = [56, 0], sizes = [56, 128], strides = [1, 1]} : vector<112x128xf32> to vector<56x128xf32>
    %8 = arith.maximumf %6, %7 : vector<56x128xf32>
    %cst_5 = arith.constant 0.000000e+00 : f32
    %9 = vector.broadcast %cst_5 : f32 to vector<56x128xf32>
    %10 = arith.maximumf %8, %9 : vector<56x128xf32>
    %c0_6 = arith.constant 0 : index
    %c0_7 = arith.constant 0 : index
    %11 = vector.load %arg4[%c0_6, %c0_7] : memref<56x1xf32, #tpu.memory_space<vmem>>, vector<56x1xf32>
    %12 = vector.broadcast %11 : vector<56x1xf32> to vector<56x128xf32>
    %13 = arith.mulf %10, %12 : vector<56x128xf32>
    %cst_8 = arith.constant dense<0.000000e+00> : vector<128xf32>
    %14 = vector.multi_reduction <add>, %13, %cst_8 [0] : vector<56x128xf32> to vector<128xf32>
    %15 = vector.shape_cast %14 : vector<128xf32> to vector<1x128xf32>
    %c0_9 = arith.constant 0 : index
    %c0_10 = arith.constant 0 : index
    %16 = vector.load %arg5[%c0_9, %c0_10] : memref<1x1xf32, #tpu.memory_space<vmem>>, vector<1x1xf32>
    %17 = vector.broadcast %16 : vector<1x1xf32> to vector<1x128xf32>
    %18 = arith.addf %15, %17 : vector<1x128xf32>
    %c0_11 = arith.constant 0 : index
    %c0_12 = arith.constant 0 : index
    %19 = vector.load %arg6[%c0_11, %c0_12] : memref<1x128xf32, #tpu.memory_space<vmem>>, vector<1x128xf32>
    tpu.vector_store %arg6[%c0_11, %c0_12], %18 {strides = array<i32>} : memref<1x128xf32, #tpu.memory_space<vmem>>, vector<1x128xf32>,
    return
  }
  func.func @transform_0(%arg0: i32) -> (i32, i32) {
    %c0_i32 = arith.constant 0 : i32
    %c0_i32_0 = arith.constant 0 : i32
    return %c0_i32, %arg0 : i32, i32
  }
  func.func @transform_1(%arg0: i32) -> (i32, i32) {
    %c0_i32 = arith.constant 0 : i32
    %c0_i32_0 = arith.constant 0 : i32
    %c0_i32_1 = arith.constant 0 : i32
    return %c0_i32, %c0_i32_0 : i32, i32
  }
  func.func @transform_2(%arg0: i32) -> (i32, i32) {
    %c0_i32 = arith.constant 0 : i32
    %c0_i32_0 = arith.constant 0 : i32
    %c0_i32_1 = arith.constant 0 : i32
    return %c0_i32, %c0_i32_0 : i32, i32
  }
  func.func @transform_3(%arg0: i32) -> (i32, i32) {
    %c0_i32 = arith.constant 0 : i32
    %c0_i32_0 = arith.constant 0 : i32
    %c0_i32_1 = arith.constant 0 : i32
    return %c0_i32, %c0_i32_0 : i32, i32
  }
  func.func @transform_4(%arg0: i32) -> (i32, i32) {
    %c0_i32 = arith.constant 0 : i32
    %c0_i32_0 = arith.constant 0 : i32
    %c0_i32_1 = arith.constant 0 : i32
    return %c0_i32, %c0_i32_0 : i32, i32
  }
  func.func @transform_5(%arg0: i32) -> (i32, i32) {
    %c0_i32 = arith.constant 0 : i32
    %c0_i32_0 = arith.constant 0 : i32
    return %c0_i32, %arg0 : i32, i32
  }
}

</mosaic_0001>

<bundles_post_ra>
// kernel: tpu_custom_call.1
= control target key start
LH: loop header
LB: loop body
LE: loop exit
PB: predicated region body
PF: predicated region fallthrough
CT: control target
= control target key end

     0   :  { %s581_s0 = inlined_call_operand.vmem [shape: f32[64,128], index: 0, kind: input, shape index: {}]   ;;  %s582_s1 = inlined_call_operand.vmem [shape: f32[112,64], index: 1, kind: input, shape index: {}]   ;;  %s583_s2 = inlined_call_operand.vmem [shape: f32[112,1], index: 2, kind: input, shape index: {}]   ;;  %s584_s3 = inlined_call_operand.vmem [shape: f32[56,1], index: 3, kind: input, shape index: {}]   ;;  %s585_s4 = inlined_call_operand.<no memory space> [shape: f32[1,1], index: 4, kind: input, shape index: {}]   ;;  %s586_s5 = inlined_call_operand.hbm [shape: f32[1,128], index: 5, kind: output, shape index: {}]  }
   0x1   :  { %v10_v0 = vstv %s585_s4 }
   0x2   :  { %11 = vst [vmem:[#allocation2] sm:$0x1] %v10_v0 }
   0x3   :  { %v44_v1 = vld [vmem:[%s581_s0 + $0x38] sm:$0xff]  ;;  %v400_v2 = vmov 0   ;;  %v49_v3 = vld [vmem:[%s583_s2 + $0x20] sm:$0xff]  ;;  %v47_v4 = vld [vmem:[%s583_s2 + $0x10] sm:$0xff] }
   0x4   :  { %373 = vset.pattern.permute.xlu2 %v400_v2  ;;  %372 = vset.pattern.permute.xlu1 %v400_v2  ;;  %v45_v5 = vld [vmem:[%s583_s2] sm:$0xff]  ;;  %v43_v6 = vld [vmem:[%s581_s0 + $0x30] sm:$0xff]  ;;  %v42_v7 = vld [vmem:[%s581_s0 + $0x28] sm:$0xff] }
   0x5   :  { %371 = vset.pattern.permute.xlu0 %v400_v2  ;;  %180 = vmatpush.msra.mxu0 %v44_v1  ;;  %v41_v8 = vld [vmem:[%s581_s0 + $0x20] sm:$0xff]  ;;  %v40_v9 = vld [vmem:[%s581_s0 + $0x18] sm:$0xff]  ;;  %v50_v10 = vld [vmem:[%s583_s2 + $0x28] sm:$0xff] }
   0x6   :  { %345 = vmatpush.msra.mxu1 %v44_v1  ;;  %346 = vmatpush.msra.mxu2 %v44_v1  ;;  %v48_v11 = vld [vmem:[%s583_s2 + $0x18] sm:$0xff]  ;;  %v46_v12 = vld [vmem:[%s583_s2 + $0x8] sm:$0xff]  ;;  %v39_v13 = vld [vmem:[%s581_s0 + $0x10] sm:$0xff] }
   0x7   :  { %347 = vmatpush.msra.mxu3 %v44_v1  ;;  %81 = vperm.xlu2 %373, %v49_v3  }
   0x8   :  { %71 = vperm.xlu1 %372, %v47_v4   ;;  %61 = vperm.xlu0 %371, %v45_v5  }
   0x9   :  { %181 = vmatpush.msra.mxu0 %v43_v6  ;;  %348 = vmatpush.msra.mxu1 %v43_v6 }
   0xa   :  { %349 = vmatpush.msra.mxu2 %v43_v6  ;;  %350 = vmatpush.msra.mxu3 %v43_v6 }
   0xb   :  { %182 = vmatpush.msra.mxu0 %v42_v7  ;;  %351 = vmatpush.msra.mxu1 %v42_v7 }
   0xc   :  { %352 = vmatpush.msra.mxu2 %v42_v7  ;;  %353 = vmatpush.msra.mxu3 %v42_v7 }
   0xd   :  { %183 = vmatpush.msra.mxu0 %v41_v8  ;;  %354 = vmatpush.msra.mxu1 %v41_v8 }
   0xe   :  { %355 = vmatpush.msra.mxu2 %v41_v8  ;;  %356 = vmatpush.msra.mxu3 %v41_v8 }
   0xf   :  { %184 = vmatpush.msra.mxu0 %v40_v9  ;;  %357 = vmatpush.msra.mxu1 %v40_v9 }
  0x10   :  { %12 = vsyncpa [#allocation4], 0  ;;  %358 = vmatpush.msra.mxu2 %v40_v9  ;;  %359 = vmatpush.msra.mxu3 %v40_v9  ;;  %v38_v14 = vld [vmem:[%s581_s0 + $0x8] sm:$0xff]  ;;  %v37_v15 = vld [vmem:[%s581_s0] sm:$0xff]  ;;  %vm129_vm0 = vcmask 523264   ;;  %s322_s4 = sshll.u32 %s586_s5, 4  ;;  %s323_s4 = int_to_ptr.hbm [resolvable:$true] %s322_s4 }
  0x11   :  { %86 = vperm.xlu2 %373, %v50_v10   ;;  %76 = vperm.xlu1 %372, %v48_v11   ;;  %v23_v16 = vld [vmem:[%s582_s1] sm:$0xff]  ;;  %v26_v17 = vld [vmem:[%s582_s1 + $0x18] sm:$0xff]  ;;  %v29_v18 = vld [vmem:[%s582_s1 + $0x30] sm:$0xff] }
  0x12   :  { %66 = vperm.xlu0 %371, %v46_v12   ;;  %185 = vmatpush.msra.mxu0 %v39_v13  ;;  %v33_v19 = vld [vmem:[%s582_s1 + $0x50] sm:$0xff]  ;;  %v53_v20 = vld [vmem:[%s583_s2 + $0x40] sm:$0xff]  ;;  %v52_v21 = vld [vmem:[%s583_s2 + $0x38] sm:$0xff] }
  0x13   :  { %360 = vmatpush.msra.mxu1 %v39_v13  ;;  %361 = vmatpush.msra.mxu2 %v39_v13  ;;  %v51_v22 = vld [vmem:[%s583_s2 + $0x30] sm:$0xff]  ;;  %v24_v23 = vld [vmem:[%s582_s1 + $0x8] sm:$0xff]  ;;  %v27_v24 = vld [vmem:[%s582_s1 + $0x20] sm:$0xff] }
  0x14   :  { %362 = vmatpush.msra.mxu3 %v39_v13  ;;  %186 = vmatpush.msra.mxu0 %v38_v14  ;;  %v30_v25 = vld [vmem:[%s582_s1 + $0x38] sm:$0xff]  ;;  %v55_v28 = vld [vmem:[%s583_s2 + $0x50] sm:$0xff]  ;;  %v54_v29 = vld [vmem:[%s583_s2 + $0x48] sm:$0xff] }
  0x15   :  { %363 = vmatpush.msra.mxu1 %v38_v14  ;;  %364 = vmatpush.msra.mxu2 %v38_v14  ;;  %v34_v26 = vld [vmem:[%s582_s1 + $0x58] sm:$0xff]  ;;  %v25_v30 = vld [vmem:[%s582_s1 + $0x10] sm:$0xff]  ;;  %v28_v31 = vld [vmem:[%s582_s1 + $0x28] sm:$0xff] }
  0x16   :  { %365 = vmatpush.msra.mxu3 %v38_v14  ;;  %187 = vmatpush.msra.mxu0 %v37_v15  ;;  %v56_v27 = vld [vmem:[%s583_s2 + $0x58] sm:$0xff]  ;;  %v31_v32 = vld [vmem:[%s582_s1 + $0x40] sm:$0xff]  ;;  %v246_v35 = vld [vmem:[%s584_s3 + $0x8] sm:$0xff] }
  0x17   :  { %366 = vmatpush.msra.mxu1 %v37_v15  ;;  %367 = vmatpush.msra.mxu2 %v37_v15  ;;  %v35_v33 = vld [vmem:[%s582_s1 + $0x60] sm:$0xff]  ;;  %v32_v37 = vld [vmem:[%s582_s1 + $0x48] sm:$0xff]  ;;  %v248_v39 = vld [vmem:[%s584_s3 + $0x18] sm:$0xff] }
  0x18   :  { %368 = vmatpush.msra.mxu3 %v37_v15  ;;  %331 = vmatmul.msk.f32.vlgmr.msra.gmra.mxu0 %vm129_vm0, %v23_v16  ;;  %v57_v34 = vld [vmem:[%s583_s2 + $0x60] sm:$0xff]  ;;  %v36_v38 = vld [vmem:[%s582_s1 + $0x68] sm:$0xff]  ;;  %v247_v41 = vld [vmem:[%s584_s3 + $0x10] sm:$0xff] }
  0x19   :  { %334 = vmatmul.msk.f32.vlgmr.msra.gmra.mxu1 %vm129_vm0, %v26_v17  ;;  %337 = vmatmul.msk.f32.vlgmr.msra.gmra.mxu2 %vm129_vm0, %v29_v18  ;;  %v245_v36 = vld [vmem:[%s584_s3] sm:$0xff]  ;;  %v58_v40 = vld [vmem:[%s583_s2 + $0x68] sm:$0xff]  ;;  %v251_v42 = vld [vmem:[%s584_s3 + $0x30] sm:$0xff] }
  0x1a   :  { %341 = vmatmul.msk.f32.vlgmr.msra.gmra.mxu3 %vm129_vm0, %v33_v19  ;;  %101 = vperm.xlu2 %373, %v53_v20   ;;  %v250_v43 = vld [vmem:[%s584_s3 + $0x28] sm:$0xff]  ;;  %v249_v44 = vld [vmem:[%s584_s3 + $0x20] sm:$0xff]  ;;  %s401_s3 = smov [#allocation3]  }
  0x1b   :  { %96 = vperm.xlu1 %372, %v52_v21   ;;  %91 = vperm.xlu0 %371, %v51_v22   ;;  %v306_v45 = vld [vmem:[#allocation2] sm:$0x1]  ;;  %s320_s24 = sshll.u32 %s401_s3, 4  ;;  %s321_s24 = int_to_ptr.vmem [resolvable:$true] %s320_s24 }
  0x20   :  { %332 = vmatmul.msk.f32.gmra.mxu0 %vm129_vm0, %v24_v23 }
  0x21   :  { %335 = vmatmul.msk.f32.gmra.mxu1 %vm129_vm0, %v27_v24  ;;  %338 = vmatmul.msk.f32.gmra.mxu2 %vm129_vm0, %v30_v25 }
  0x22   :  { %342 = vmatmul.msk.f32.gmra.mxu3 %vm129_vm0, %v34_v26  ;;  %116 = vperm.xlu2 %373, %v56_v27  }
  0x23   :  { %111 = vperm.xlu1 %372, %v55_v28   ;;  %106 = vperm.xlu0 %371, %v54_v29  }
  0x28   :  { %333 = vmatmul.msk.f32.gmra.mxu0 %vm129_vm0, %v25_v30 }
  0x29   :  { %336 = vmatmul.msk.f32.gmra.mxu1 %vm129_vm0, %v28_v31  ;;  %339 = vmatmul.msk.f32.gmra.mxu2 %vm129_vm0, %v31_v32 }
  0x2a   :  { %343 = vmatmul.msk.f32.gmra.mxu3 %vm129_vm0, %v35_v33  ;;  %121 = vperm.xlu2 %373, %v57_v34  }
  0x2b   :  { %259 = vperm.xlu1 %372, %v246_v35   ;;  %254 = vperm.xlu0 %371, %v245_v36  }
  0x31   :  { %340 = vmatmul.msk.f32.gmra.mxu2 %vm129_vm0, %v32_v37 }
  0x32   :  { %344 = vmatmul.msk.f32.gmra.mxu3 %vm129_vm0, %v36_v38  ;;  %269 = vperm.xlu2 %373, %v248_v39  }
  0x33   :  { %126 = vperm.xlu1 %372, %v58_v40   ;;  %264 = vperm.xlu0 %371, %v247_v41  }
  0x3a   :  { %284 = vperm.xlu2 %373, %v251_v42  }
  0x3b   :  { %279 = vperm.xlu1 %372, %v250_v43   ;;  %274 = vperm.xlu0 %371, %v249_v44  }
  0x43   :  { %309 = vperm.xlu0 %371, %v306_v45  }
  0x61   :  { %v82_v48 = vpop.permute.xlu2 %81 }
  0x6b   :  { %v87_v51 = vpop.permute.xlu2 %86 }
  0x74   :  { %v102_v54 = vpop.permute.xlu2 %101 }
  0x7a   :  { %v62_v46 = vpop.permute.xlu0 %61  ;;  %v72_v47 = vpop.permute.xlu1 %71 }
  0x7c   :  { %v117_v61 = vpop.permute.xlu2 %116 }
  0x83   :  { %v77_v50 = vpop.permute.xlu1 %76 }
  0x84   :  { %v67_v49 = vpop.permute.xlu0 %66  ;;  %v122_v9 = vpop.permute.xlu2 %121 }
  0x8c   :  { %v270_v33 = vpop.permute.xlu2 %269 }
  0x8d   :  { %v92_v52 = vpop.permute.xlu0 %91  ;;  %v97_v53 = vpop.permute.xlu1 %96 }
  0x95   :  { %v107_v57 = vpop.permute.xlu0 %106  ;;  %v189_v58 = vpop.f32.mrf.mxu0 }
  0x96   :  { %v198_v59 = vpop.f32.mrf.mxu1  ;;  %v112_v60 = vpop.permute.xlu1 %111  ;;  %v190_v10 = vadd.f32 %v189_v58, %v62_v46 }
  0x97   :  { %v199_v14 = vadd.f32 %v198_v59, %v77_v50 }
  0x9c   :  { %v207_v55 = vpop.f32.mrf.mxu2 }
  0x9d   :  { %v219_v56 = vpop.f32.mrf.mxu3  ;;  %v255_v0 = vpop.permute.xlu0 %254  ;;  %v208_v34 = vadd.f32 %v207_v55, %v92_v52 }
  0x9e   :  { %v192_v1 = vpop.f32.mrf.mxu0  ;;  %v201_v2 = vpop.f32.mrf.mxu1  ;;  %v220_v12 = vadd.f32 %v219_v56, %v112_v60 }
  0x9f   :  { %v260_v3 = vpop.permute.xlu1 %259  ;;  %v193_v5 = vadd.f32 %v192_v1, %v67_v49  ;;  %v202_v27 = vadd.f32 %v201_v2, %v82_v48  ;;  %v285_v52 = vpop.permute.xlu2 %284 }
  0xa0   :  { %v234_v18 = vmax.f32 %v199_v14, %v220_v12 }
  0xa2   :  { %v241_v35 = vmax.f32 %v234_v18, 0.0 }
  0xa4   :  { %v210_v62 = vpop.f32.mrf.mxu2  ;;  %v290_v44 = vmul.f32 %v270_v33, %v241_v35 }
  0xa5   :  { %v222_v63 = vpop.f32.mrf.mxu3  ;;  %v211_v6 = vadd.f32 %v210_v62, %v97_v53  ;;  %v265_v15 = vpop.permute.xlu0 %264 }
  0xa6   :  { %v195_v16 = vpop.f32.mrf.mxu0  ;;  %v223_v19 = vadd.f32 %v222_v63, %v117_v61  ;;  %v204_v20 = vpop.f32.mrf.mxu1 }
  0xa7   :  { %v231_v13 = vmax.f32 %v190_v10, %v211_v6  ;;  %v196_v23 = vadd.f32 %v195_v16, %v72_v47  ;;  %v127_v28 = vpop.permute.xlu1 %126  ;;  %v205_v29 = vadd.f32 %v204_v20, %v87_v51 }
  0xa8   :  { %v235_v37 = vmax.f32 %v202_v27, %v223_v19 }
  0xa9   :  { %v238_v22 = vmax.f32 %v231_v13, 0.0 }
  0xaa   :  { %v242_v46 = vmax.f32 %v235_v37, 0.0 }
  0xab   :  { %v287_v36 = vmul.f32 %v255_v0, %v238_v22 }
  0xac   :  { %v213_v4 = vpop.f32.mrf.mxu2 }
  0xad   :  { %v214_v7 = vadd.f32 %v213_v4, %v102_v54  ;;  %v225_v8 = vpop.f32.mrf.mxu3  ;;  %v275_v43 = vpop.permute.xlu0 %274 }
  0xae   :  { %v226_v24 = vadd.f32 %v225_v8, %v122_v9  ;;  %v291_v48 = vmul.f32 %v275_v43, %v242_v46 }
  0xaf   :  { %v232_v11 = vmax.f32 %v193_v5, %v214_v7  ;;  %v280_v51 = vpop.permute.xlu1 %279 }
  0xb0   :  { %v236_v38 = vmax.f32 %v205_v29, %v226_v24 }
  0xb1   :  { %v239_v17 = vmax.f32 %v232_v11, 0.0 }
  0xb2   :  { %v243_v45 = vmax.f32 %v236_v38, 0.0 }
  0xb3   :  { %v288_v30 = vmul.f32 %v260_v3, %v239_v17 }
  0xb4   :  { %v216_v21 = vpop.f32.mrf.mxu2  ;;  %v292_v53 = vmul.f32 %v280_v51, %v243_v45 }
  0xb5   :  { %v217_v25 = vadd.f32 %v216_v21, %v107_v57  ;;  %v228_v26 = vpop.f32.mrf.mxu3  ;;  %v294_v40 = vadd.f32 %v288_v30, %v287_v36  ;;  %v310_v62 = vpop.permute.xlu0 %309 }
  0xb6   :  { %v229_v32 = vadd.f32 %v228_v26, %v127_v28  ;;  %v312_v1 = vperm.slane %v310_v62, 0 }
  0xb7   :  { %v233_v31 = vmax.f32 %v196_v23, %v217_v25 }
  0xb8   :  { %v237_v42 = vmax.f32 %v208_v34, %v229_v32 }
  0xb9   :  { %v240_v39 = vmax.f32 %v233_v31, 0.0 }
  0xba   :  { %v244_v50 = vmax.f32 %v237_v42, 0.0 }
  0xbb   :  { %v289_v41 = vmul.f32 %v265_v15, %v240_v39 }
  0xbc   :  { %v293_v55 = vmul.f32 %v285_v52, %v244_v50 }
  0xbd   :  { %v295_v47 = vadd.f32 %v294_v40, %v289_v41 }
  0xbf   :  { %v296_v49 = vadd.f32 %v295_v47, %v290_v44 }
  0xc1   :  { %v297_v54 = vadd.f32 %v296_v49, %v291_v48 }
  0xc3   :  { %v298_v56 = vadd.f32 %v297_v54, %v292_v53 }
  0xc5   :  { %v299_v57 = vadd.f32 %v298_v56, %v293_v55 }
  0xc7   :  { %v300_v58 = vrot.slane %v299_v57, 4 }
  0xc9   :  { %v301_v59 = vadd.f32 %v300_v58, %v299_v57 }
  0xcb   :  { %v302_v60 = vrot.slane %v301_v59, 2 }
  0xcd   :  { %v303_v61 = vadd.f32 %v302_v60, %v301_v59 }
  0xcf   :  { %v304_v63 = vrot.slane %v303_v61, 1 }
  0xd1   :  { %v305_v0 = vadd.f32 %v304_v63, %v303_v61 }
  0xd3   :  { %v313_v2 = vadd.f32 %v312_v1, %v305_v0 }
  0xd5   :  { %314 = vst [vmem:[#allocation3] sm:$0x1] %v313_v2 }
  0xd6   :  { %325 = dma.vmem_to_hbm [thread:$0]  %s321_s24, 16, %s323_s4, [#allocation4]  }
  0xd7   :  { %398 = dma.done.wait [#allocation4], 16  }
  0xd8   :  { %399 = vsyncadd [#allocation4], 4294967280 }
  0xd9   :  { %330 = vsyncpa [#allocation4], 1 }

</bundles_post_ra>
